<compile_context>
chip_gen: v7x
topology: tpu7x:2x2x1
jax: 0.10.0
libtpu: 0.0.40
codegen_flags: <defaults>
</compile_context>

<pallas_src>
import math
import functools

import jax
import jax.numpy as jnp
from jax import lax
from jax.experimental import pallas as pl
from jax.experimental.pallas import tpu as pltpu

EPS = 1e-8


def _pick_tile(total, quantum, target):
    """Largest divisor of `total` that is a multiple of `quantum` and <= target.
    Falls back to the full extent (always a legal block size)."""
    if total <= target:
        return total
    best = None
    c = quantum
    while c <= target:
        if total % c == 0:
            best = c
        c += quantum
    return best if best is not None else total


def _modconv_kernel(taps_ref, w_ref, s_ref, out_ref, w_scratch, *, demodulate):
    # Compute the modulated (+ demodulated) bf16 weight tile once per
    # (batch, cout-tile) and reuse it across all spatial tiles
    # (the HW axis is innermost in the grid).
    @pl.when(pl.program_id(2) == 0)
    def _():
        w = w_ref[...] * s_ref[0]                            # (tc, K) f32
        if demodulate:
            d = lax.rsqrt(jnp.sum(w * w, axis=1, keepdims=True) + EPS)
            w = w * d
        w_scratch[...] = w.astype(w_scratch.dtype)           # bf16 for the MXU

    # Single fused matmul: (tc, K) @ (K, th), f32 accumulation on the MXU.
    out_ref[0] = jnp.dot(w_scratch[...], taps_ref[0],
                         preferred_element_type=jnp.float32
                         ).astype(out_ref.dtype)


def modulated_conv2d(x, style, weight, mod_weight, mod_bias, *,
                     k, style_dim, demodulate=True):
    """ModulatedConv2d.forward (fused=True, upsample=downsample=False)."""
    B, Cin, H, W = x.shape
    Cout = weight.shape[1]
    KK = k * k
    K = KK * Cin
    HW = H * W
    p = k // 2

    conv_scale = 1.0 / math.sqrt(Cin * k * k)
    mod_scale = 1.0 / math.sqrt(style_dim)

    # ---- plain-JAX glue: EqualLinear modulation, weight layout, im2col ----
    # EqualLinear (lr_mul=1, bias_init=1): s = style @ (W * scale).T + b
    s = style @ (mod_weight * mod_scale).T + mod_bias               # (B, Cin)
    # Tile style across the k*k taps so it lines up with the (Cout, K) weight
    # layout; the kernel then needs no in-kernel reshape/relayout.
    s_tiled = jnp.tile(s, (1, KK)).reshape(B, 1, K).astype(jnp.float32)

    # Base conv weight -> (Cout, K) with flat index (ki*k + kj)*Cin + c.
    wbase = jnp.transpose(weight[0], (0, 2, 3, 1)).reshape(Cout, K)
    wbase = (wbase * conv_scale).astype(jnp.float32)

    # im2col taps in bf16 (halves HBM traffic, feeds the bf16-native MXU).
    # TODO(synk): build the taps in-kernel from the padded input (shifted
    # pl.ds slices / pltpu.roll with border masking) to avoid the k*k-fold
    # HBM duplication this stack still materializes.
    xpad = jnp.pad(x, ((0, 0), (0, 0), (p, p), (p, p)))
    taps = jnp.stack(
        [xpad[:, :, ki:ki + H, kj:kj + W]
         for ki in range(k) for kj in range(k)],
        axis=1)                                      # (B, KK, Cin, H, W)
    taps = taps.reshape(B, K, HW).astype(jnp.bfloat16)

    # ---- tiling (sized so bf16 tap tiles double-buffer within v7x VMEM) ----
    th = _pick_tile(HW, 128, 1024)    # lane-dense spatial tile
    tc = _pick_tile(Cout, 8, 256)     # output-channel tile
    grid = (B, Cout // tc, HW // th)

    kernel = functools.partial(_modconv_kernel, demodulate=demodulate)

    cost = pl.CostEstimate(
        flops=2 * B * Cout * K * HW,
        transcendentals=0,
        bytes_accessed=int(B * K * HW * 2          # bf16 taps
                           + B * Cout * K * 4      # base weight (per batch)
                           + B * K * 4             # style
                           + B * Cout * HW * 4))   # f32 output

    out_flat = pl.pallas_call(
        kernel,
        out_shape=jax.ShapeDtypeStruct((B, Cout, HW), jnp.float32),
        grid_spec=pltpu.PrefetchScalarGridSpec(
            num_scalar_prefetch=0,
            grid=grid,
            in_specs=[
                pl.BlockSpec((1, K, th), lambda b, c, h: (b, 0, h)),   # taps
                pl.BlockSpec((tc, K), lambda b, c, h: (c, 0)),         # base W
                pl.BlockSpec((1, 1, K), lambda b, c, h: (b, 0, 0)),    # style
            ],
            out_specs=pl.BlockSpec((1, tc, th), lambda b, c, h: (b, c, h)),
            scratch_shapes=[pltpu.VMEM((tc, K), jnp.bfloat16)],
        ),
        compiler_params=pltpu.CompilerParams(
            dimension_semantics=("parallel", "parallel", "arbitrary"),
            vmem_limit_bytes=64 * 1024 * 1024),
        cost_estimate=cost,
    )(taps, wbase, s_tiled)

    return out_flat.reshape(B, Cout, H, W)


def ref_modulated_conv2d(x, style, weight, mod_weight, mod_bias, *,
                         k, style_dim, demodulate=True):
    """Pure-JAX reference mirroring the PyTorch fused forward (f32)."""
    B, Cin, H, W = x.shape
    Cout = weight.shape[1]
    s = style @ (mod_weight * (1.0 / math.sqrt(style_dim))).T + mod_bias
    scale = 1.0 / math.sqrt(Cin * k * k)
    w = scale * weight * s[:, None, :, None, None]          # (B,Cout,Cin,k,k)
    if demodulate:
        demod = lax.rsqrt(jnp.sum(w * w, axis=(2, 3, 4)) + EPS)
        w = w * demod[:, :, None, None, None]
    outs = []
    for b in range(B):
        o = lax.conv_general_dilated(
            x[b:b + 1], w[b], window_strides=(1, 1), padding="SAME",
            dimension_numbers=("NCHW", "OIHW", "NCHW"))
        outs.append(o)
    return jnp.concatenate(outs, axis=0)


if __name__ == "__main__":
    B, Cin, Cout, H, W = 2, 4, 8, 16, 16
    k, style_dim = 3, 16

    key = jax.random.PRNGKey(0)
    ks = jax.random.split(key, 4)
    x = jax.random.normal(ks[0], (B, Cin, H, W), jnp.float32)
    style = jax.random.normal(ks[1], (B, style_dim), jnp.float32)

    # Parameters matching ModulatedConv2d.__init__ shapes / inits:
    weight = jax.random.normal(ks[2], (1, Cout, Cin, k, k), jnp.float32)  # .weight
    mod_weight = jax.random.normal(ks[3], (Cin, style_dim), jnp.float32)  # EqualLinear.weight
    mod_bias = jnp.ones((Cin,), jnp.float32)                              # bias_init=1

    out = modulated_conv2d(x, style, weight, mod_weight, mod_bias,
                           k=k, style_dim=style_dim)
    out = jax.block_until_ready(out)

    ref = ref_modulated_conv2d(x, style, weight, mod_weight, mod_bias,
                               k=k, style_dim=style_dim)
    assert out.shape == (B, Cout, H, W)
    # bf16 MXU inputs (f32 accumulation) vs f32 reference -> loosened tolerance.
    assert jnp.allclose(out, ref, atol=5e-2, rtol=5e-2), (
        f"max abs err {jnp.max(jnp.abs(out - ref))}")
    print("KERNEL_OK")
</pallas_src>

<mosaic_0001>
module attributes {stable_mosaic.version = 11 : i64} {
  func.func @_modconv_kernel(%arg0: i32, %arg1: i32, %arg2: i32, %arg3: memref<1x36x256xbf16, #tpu.memory_space<vmem>>, %arg4: memref<8x36xf32, #tpu.memory_space<vmem>>, %arg5: memref<1x1x36xf32, #tpu.memory_space<vmem>>, %arg6: memref<1x8x256xf32, #tpu.memory_space<vmem>>, %arg7: memref<8x36xbf16, #tpu.memory_space<vmem>>) attributes {dimension_semantics = [#tpu.dimension_semantics<parallel>, #tpu.dimension_semantics<parallel>, #tpu.dimension_semantics<arbitrary>], iteration_bounds = array<i64: 2, 1, 1>, scalar_prefetch = 0 : i64, scratch_operands = 1 : i64, tpu.core_type = #tpu.core_type<tc>, window_params = [{transform_indices = @transform_0, window_bounds = array<i64: 1, 36, 256>}, {transform_indices = @transform_1, window_bounds = array<i64: 8, 36>}, {transform_indices = @transform_2, window_bounds = array<i64: 1, 1, 36>}, {transform_indices = @transform_3, window_bounds = array<i64: 1, 8, 256>}]} {
    %c0_i32 = arith.constant 0 : i32
    %0 = arith.cmpi eq, %arg2, %c0_i32 : i32
    %1 = arith.extui %0 : i1 to i32
    %c0_i32_0 = arith.constant 0 : i32
    %2 = arith.cmpi ne, %1, %c0_i32_0 : i32
    scf.if %2 {
      %c0_8 = arith.constant 0 : index
      %c0_9 = arith.constant 0 : index
      %10 = vector.load %arg4[%c0_8, %c0_9] : memref<8x36xf32, #tpu.memory_space<vmem>>, vector<8x36xf32>
      %c0_10 = arith.constant 0 : index
      %c0_11 = arith.constant 0 : index
      %c0_12 = arith.constant 0 : index
      %11 = vector.load %arg5[%c0_10, %c0_11, %c0_12] : memref<1x1x36xf32, #tpu.memory_space<vmem>>, vector<1x1x36xf32>
      %12 = vector.shape_cast %11 : vector<1x1x36xf32> to vector<1x36xf32>
      %13 = vector.broadcast %12 : vector<1x36xf32> to vector<8x36xf32>
      %14 = arith.mulf %10, %13 : vector<8x36xf32>
      %15 = arith.mulf %14, %14 : vector<8x36xf32>
      %cst_13 = arith.constant dense<0.000000e+00> : vector<8xf32>
      %16 = vector.multi_reduction <add>, %15, %cst_13 [1] : vector<8x36xf32> to vector<8xf32>
      %17 = vector.shape_cast %16 : vector<8xf32> to vector<8x1xf32>
      %cst_14 = arith.constant 9.99999993E-9 : f32
      %18 = vector.broadcast %cst_14 : f32 to vector<8x1xf32>
      %19 = arith.addf %17, %18 : vector<8x1xf32>
      %20 = math.rsqrt %19 : vector<8x1xf32>
      %21 = vector.broadcast %20 : vector<8x1xf32> to vector<8x36xf32>
      %22 = arith.mulf %14, %21 : vector<8x36xf32>
      %23 = arith.truncf %22 : vector<8x36xf32> to vector<8x36xbf16>
      %c0_15 = arith.constant 0 : index
      %c0_16 = arith.constant 0 : index
      %24 = vector.load %arg7[%c0_15, %c0_16] : memref<8x36xbf16, #tpu.memory_space<vmem>>, vector<8x36xbf16>
      tpu.vector_store %arg7[%c0_15, %c0_16], %23 {strides = array<i32>} : memref<8x36xbf16, #tpu.memory_space<vmem>>, vector<8x36xbf16>,
    } else {
    }
    %c0 = arith.constant 0 : index
    %c0_1 = arith.constant 0 : index
    %3 = vector.load %arg7[%c0, %c0_1] : memref<8x36xbf16, #tpu.memory_space<vmem>>, vector<8x36xbf16>
    %c0_2 = arith.constant 0 : index
    %c0_3 = arith.constant 0 : index
    %c0_4 = arith.constant 0 : index
    %4 = vector.load %arg3[%c0_2, %c0_3, %c0_4] : memref<1x36x256xbf16, #tpu.memory_space<vmem>>, vector<1x36x256xbf16>
    %5 = vector.shape_cast %4 : vector<1x36x256xbf16> to vector<36x256xbf16>
    %cst = arith.constant dense<0.000000e+00> : vector<8x256xf32>
    %6 = tpu.matmul %3, %5, %cst {dimension_numbers = #tpu.dot_dimension_numbers<[1], [0], [0], [1], [0, 0, 1, 1], [], []>} : vector<8x36xbf16>, vector<36x256xbf16>, vector<8x256xf32> -> vector<8x256xf32>
    %c0_5 = arith.constant 0 : index
    %c0_6 = arith.constant 0 : index
    %c0_7 = arith.constant 0 : index
    %7 = vector.load %arg6[%c0_5, %c0_6, %c0_7] : memref<1x8x256xf32, #tpu.memory_space<vmem>>, vector<1x8x256xf32>
    %8 = vector.shape_cast %7 : vector<1x8x256xf32> to vector<8x256xf32>
    %9 = vector.shape_cast %6 : vector<8x256xf32> to vector<1x8x256xf32>
    tpu.vector_store %arg6[%c0_5, %c0_6, %c0_7], %9 {strides = array<i32>} : memref<1x8x256xf32, #tpu.memory_space<vmem>>, vector<1x8x256xf32>,
    return
  }
  func.func @transform_0(%arg0: i32, %arg1: i32, %arg2: i32) -> (i32, i32, i32) {
    %c0_i32 = arith.constant 0 : i32
    %c0_i32_0 = arith.constant 0 : i32
    return %arg0, %c0_i32, %arg2 : i32, i32, i32
  }
  func.func @transform_1(%arg0: i32, %arg1: i32, %arg2: i32) -> (i32, i32) {
    %c0_i32 = arith.constant 0 : i32
    %c0_i32_0 = arith.constant 0 : i32
    return %arg1, %c0_i32 : i32, i32
  }
  func.func @transform_2(%arg0: i32, %arg1: i32, %arg2: i32) -> (i32, i32, i32) {
    %c0_i32 = arith.constant 0 : i32
    %c0_i32_0 = arith.constant 0 : i32
    %c0_i32_1 = arith.constant 0 : i32
    return %arg0, %c0_i32, %c0_i32_0 : i32, i32, i32
  }
  func.func @transform_3(%arg0: i32, %arg1: i32, %arg2: i32) -> (i32, i32, i32) {
    %c0_i32 = arith.constant 0 : i32
    return %arg0, %arg1, %arg2 : i32, i32, i32
  }
}

</mosaic_0001>

<bundles_post_ra>
// kernel: tpu_custom_call.1
= control target key start
LH: loop header
LB: loop body
LE: loop exit
PB: predicated region body
PF: predicated region fallthrough
CT: control target
= control target key end

     0   :  { %s1099_s0 = inlined_call_operand.hbm [shape: bf16[2,36,256], index: 0, kind: input, shape index: {}]   ;;  %s1100_s1 = inlined_call_operand.hbm [shape: f32[8,36], index: 1, kind: input, shape index: {}]   ;;  %s1101_s2 = inlined_call_operand.hbm [shape: f32[2,1,36], index: 2, kind: input, shape index: {}]   ;;  %s1102_s3 = inlined_call_operand.hbm [shape: f32[2,8,256], index: 3, kind: output, shape index: {}]  }
   0x1   :  { %1108 = sst [smem:[#allocation14_spill]] %s1099_s0 }
   0x2   :  { %8 = vsyncpa [#allocation4], 0 }
   0x3   :  { %10 = vsyncpa [#allocation4 + $0x1], 0 }
   0x4   :  { %11 = vsyncpa [#allocation7], 0 }
   0x5   :  { %12 = vsyncpa [#allocation5], 0 }
   0x6   :  { %14 = vsyncpa [#allocation5 + $0x1], 0  ;;  %s842_s12 = smov 0   ;;  %s844_s13 = smov 0  }
   0x7   :  { %s846_s14 = smov 0   ;;  %s848_s15 = smov 0  }
   0x8   :  { %s850_s16 = smov 0   ;;  %s852_s17 = smov 0  }
   0x9 LB: > { %s39_s18 = sadd.s32 1, %s809_s16  ;;  %s48_s19 = sadd.s32 1, %s801_s14  ;;  %s813_s17 = sphi %s852_s17, %s20_s17   ;;  %s809_s16 = sphi %s850_s16, %s1128_s16   ;;  %s805_s15 = sphi %s848_s15, %s1127_s15   ;;  %s801_s14 = sphi %s846_s14, %s1126_s14   ;;  %s797_s13 = sphi %s844_s13, %s1125_s13   ;;  %s793_s12 = sphi %s842_s12, %s1124_s12  }
   0xa   : > { %p41_p0 = scmp.ge.s32.totalorder %s39_s18, 2  ;;  %p55_p1 = scmp.ne.s32.totalorder %s801_s14, %s797_s13 }
   0xb   : > { %p56_p2 = scmp.eq.s32.totalorder %s813_s17, 0  ;;  %p570_p5 = scmp.lt.s32.totalorder %s813_s17, 2 }
   0xc   : > { %s1130_s18 = smov (%p41_p0, %s39_s18), 0  ;;  %s180_s21 = sand.u32 1, %s813_s17  }
   0xd   : > { %p57_p4 = por %p56_p2, %p55_p1  ;;  %s43_s20 = ssub.s32 %s809_s16, %s1130_s18 }
   0xe   : > { %p46_p6 = scmp.eq.s32.totalorder %s43_s20, 0  ;;  %s182_s22 = sand.u32 1, %s801_s14  }
   0xf   : > { %s542_s23 = smul.u32 640, %s809_s16  ;;  %s1109_s0 = sld [smem:[#allocation14_spill]] }
  0x10   : > { %s890_s24 = scalar_select %p46_p6, %s801_s14, %s48_s19  }
  0x11   : > { %s541_s25 = smul.u32 40, %s182_s22  ;;  %p899_p7 = pnand %p570_p5, %p57_p4 }
  0x12   : > { %s905_s5 = scalar_lea.sflag [#allocation4], %s180_s21 }
  0x13   : > { %s184_s30 = scalar_lea.vmem [#allocation3], %s541_s25  ;;  %p637_p9 = pneg %p899_p7 }
  0x14   : > { %s193_s4 = sshll.u32 %s184_s30, 4  ;;  %s903_s4 = int_to_ptr.vmem [resolvable:$true] %s193_s4 }
  0x15   : > { %s897_s28 = scalar_lea.hbm %s1109_s0, %s542_s23  ;;  %s640_s9 = scalar_lea.hbm %s1109_s0, 1280 }
  0x16   : > { %s635_s6 = scalar_lea.hbm %s897_s28, 640  ;;  %p641_p12 = scmp.lt.u32.totalorder %s897_s28, %s1109_s0 }
  0x17   : > { %p636_p8 = scmp.ne.s32.totalorder %s897_s28, %s635_s6  ;;  %p642_p13 = scmp.lt.u32.totalorder %s640_s9, %s635_s6 }
  0x18   : > { %p644_p2 = scmp.lt.u32.totalorder %s635_s6, %s897_s28 }
  0x19   : > { %p638_p10 = pnand %p637_p9, %p636_p8  ;;  %p643_p0 = por %p642_p13, %p641_p12 }
  0x1b   : > { %p639_p11 = pneg %p638_p10  ;;  %p645_p4 = por %p644_p2, %p643_p0 }
  0x1d   : > { %p646_p5 = pnand %p645_p4, %p639_p11 }
  0x1f   : > { %649 = shalt.err (!%p646_p5)
}
  0x20   : > { %s650_s19 = scalar_lea.vmem %s903_s4, 640  ;;  %s815_s20 = smov [#allocation3]  }
  0x21   : > { %p651_p6 = scmp.ne.s32.totalorder %s903_s4, %s650_s19  ;;  %s655_s21 = sshll.u32 %s815_s20, 4  ;;  %s656_s21 = int_to_ptr.vmem [resolvable:$false] %s655_s21 }
  0x22   : > { %s657_s23 = scalar_lea.vmem %s656_s21, 1280  ;;  %p658_p3 = scmp.lt.s32.totalorder %s903_s4, %s656_s21 }
  0x23   : > { %p653_p8 = pnand %p651_p6, %p637_p9  ;;  %p659_p12 = scmp.lt.s32.totalorder %s657_s23, %s650_s19 }
  0x25   : > { %p654_p10 = pneg %p653_p8  ;;  %p660_p13 = por %p659_p12, %p658_p3 }
  0x27   : > { %p661_p0 = pnand %p660_p13, %p654_p10 }
  0x29   : > { %664 = shalt.err (!%p661_p0)
}
  0x2a   : > { %s816_s25 = smov 128   ;;  %s817_s26 = smov 8  }
  0x2b   : > { %561 = dma.hbm_to_vmem [thread:$0]  (!%p899_p7), %s897_s28, 640, %s903_s4, %s905_s5, %s816_s25, %s816_s25, %s817_s26  }
  0x2c   : > { %s934_s27 = sadd.s32 4294967295, %s813_s17   ;;  %s517_s30 = sadd.s32 4294967294, %s813_s17  }
  0x2d   : > { %p61_p3 = scmp.ne.s32.totalorder %s797_s13, %s793_s12  ;;  %p1103_p11 = scmp.eq.s32.totalorder %s934_s27, 0 }
  0x2e   : > { %p141_p2 = scmp.eq.s32.totalorder %s934_s27, 1  ;;  %p147_p4 = scmp.eq.s32.totalorder %s517_s30, 1 }
  0x2f   : > { %p518_p5 = scmp.ge.s32.totalorder %s813_s17, 1  ;;  %p944_p6 = por %p1103_p11, %p61_p3 }
  0x30   : > { %p951_p8 = por %p141_p2, %p55_p1  ;;  %p955_p10 = por %p147_p4, %p61_p3 }
  0x31   : > { %s1111_s6 = scalar_select %p944_p6, 1, 0 }
  0x32   : > { %s1112_s28 = scalar_select %p951_p8, 1, 0 }
  0x33   : > { %s1113_s4 = scalar_select %p955_p10, 1, 0 }
  0x34   : > { %p154_p12 = scmp.lt.s32.totalorder %s813_s17, 3  ;;  %s818_s8 = smov [#allocation6]  }
  0x35   : > { %s169_s9 = sshll.u32 %s818_s8, 4  ;;  %s522_s10 = sshll.u32 %s809_s16, 4  ;;  %s964_s9 = int_to_ptr.vmem [resolvable:$true] %s169_s9 }
  0x36   : > { %p960_p13 = pnand %p518_p5, %p154_p12  ;;  %s972_s20 = scalar_lea.hbm %s1101_s2, %s522_s10 }
  0x37   : > { %s206_s21 = scalar_lea.vmem [#allocation8], %s182_s22  ;;  %s665_s26 = scalar_lea.hbm %s972_s20, 16 }
  0x38   : > { %s1114_s7 = scalar_select %p960_p13, 1, 0 }
  0x39   : > { %p554_p1 = pneg %p960_p13  ;;  %s213_s23 = sshll.u32 %s206_s21, 4  ;;  %s214_s23 = int_to_ptr.vmem [resolvable:$true] %s213_s23 }
  0x3a   : > { %p666_p3 = scmp.ne.s32.totalorder %s972_s20, %s665_s26  ;;  %s670_s10 = scalar_lea.hbm %s1101_s2, 32 }
  0x3b   : > { %p978_p0 = pnand %p554_p1, %p1103_p11  ;;  %p671_p5 = scmp.lt.u32.totalorder %s972_s20, %s1101_s2 }
  0x3c   : > { %p668_p2 = pnand %p666_p3, %p637_p9  ;;  %p672_p12 = scmp.lt.u32.totalorder %s670_s10, %s665_s26 }
  0x3d   : > { %s1115_s25 = scalar_select %p978_p0, 1, 0 }
  0x3e   : > { %p669_p4 = pneg %p668_p2  ;;  %p673_p1 = por %p672_p12, %p671_p5 }
  0x3f   : > { %p674_p11 = scmp.lt.u32.totalorder %s665_s26, %s972_s20 }
  0x41   : > { %p675_p10 = por %p674_p11, %p673_p1 }
  0x43   : > { %p676_p8 = pnand %p675_p10, %p669_p4 }
  0x45   : > { %679 = shalt.err (!%p676_p8)
}
  0x46   : > { %s680_s22 = scalar_lea.vmem %s214_s23, 16  ;;  %s819_s21 = smov [#allocation8]  }
  0x47   : > { %p681_p6 = scmp.ne.s32.totalorder %s214_s23, %s680_s22  ;;  %s685_s30 = sshll.u32 %s819_s21, 4  ;;  %s686_s30 = int_to_ptr.vmem [resolvable:$false] %s685_s30 }
  0x48   : > { %s687_s8 = scalar_lea.vmem %s686_s30, 32  ;;  %p688_p13 = scmp.lt.s32.totalorder %s214_s23, %s686_s30 }
  0x49   : > { %p683_p3 = pnand %p681_p6, %p637_p9  ;;  %p689_p0 = scmp.lt.s32.totalorder %s687_s8, %s680_s22 }
  0x4b   : > { %p684_p2 = pneg %p683_p3  ;;  %p690_p5 = por %p689_p0, %p688_p13 }
  0x4d   : > { %p691_p12 = pnand %p690_p5, %p684_p2 }
  0x4f   : > { %694 = shalt.err (!%p691_p12)
}
  0x50   : > { %564 = dma.hbm_to_vmem [thread:$0]  (!%p899_p7), %s972_s20, 16, %s214_s23, %s905_s5  }
  0x51   : > { %s695_s11 = scalar_lea.hbm %s1100_s1, 128  ;;  %p1116_p11 = scmp.ne.s32.totalorder %s1115_s25, 0 }
  0x52   : > { %p696_p9 = scmp.ne.s32.totalorder %s1100_s1, %s695_s11  ;;  %p702_p13 = scmp.lt.u32.totalorder %s695_s11, %s1100_s1 }
  0x53   : > { %p697_p6 = pneg %p1116_p11 }
  0x55   : > { %p698_p8 = pnand %p697_p6, %p696_p9 }
  0x57   : > { %p699_p10 = pneg %p698_p8 }
  0x59   : > { %p704_p0 = pnand %p702_p13, %p699_p10 }
  0x5b   : > { %707 = shalt.err (!%p704_p0)
}
  0x5c   : > { %s708_s29 = scalar_lea.vmem %s964_s9, 128  ;;  %p716_p3 = scmp.lt.s32.totalorder %s964_s9, %s964_s9 }
  0x5d   : > { %p709_p7 = scmp.ne.s32.totalorder %s964_s9, %s708_s29  ;;  %p717_p2 = scmp.lt.s32.totalorder %s708_s29, %s708_s29 }
  0x5f   : > { %p711_p4 = pnand %p709_p7, %p697_p6  ;;  %p718_p5 = por %p717_p2, %p716_p3 }
  0x61   : > { %p712_p1 = pneg %p711_p4 }
  0x63   : > { %p719_p12 = pnand %p718_p5, %p712_p1 }
  0x65   : > { %722 = shalt.err (!%p719_p12)
}
  0x66   : > { %557 = dma.hbm_to_vmem [thread:$0]  (!%p1116_p11), %s1100_s1, 128, %s964_s9, [#allocation7]  }
  0x67   : > { %p1117_p9 = scmp.ne.s32.totalorder %s1114_s7, 0 }
  0x68   : > { %s224_s20 = sand.u32 (!%p1117_p9), 1, %s934_s27   ;;  %s1027_s23 = sand.u32 (!%p1117_p9), 1, %s797_s13  }
  0x69   : > { %222 = sbr.rel (%p1117_p9) target bundleno = 520 (0x208), region = 32  ;;  %s225_s8 = scalar_lea.sflag (!%p1117_p9), [#allocation4], %s224_s20 }
  0x6a   : > { %s543_s30 = smul.u32 (!%p1117_p9), 40, %s1027_s23  ;;  %p1118_p6 = scmp.ne.s32.totalorder (!%p1117_p9), %s1111_s6, 0 }
  0x6c   : > { %s228_s26 = scalar_lea.vmem (!%p1117_p9), [#allocation3], %s543_s30 }
  0x70   : > { %776 = dma.done.wait (%p1118_p6), %s225_s8, 640  }
  0x71   : > { %778 = vsyncadd (%p1118_p6), %s225_s8, 4294966656  ;;  %p1119_p11 = scmp.eq.s32.totalorder %s934_s27, 0 }
  0x73   : > { %780 = dma.done.wait (%p1119_p11), [#allocation7], 128   ;;  %p1120_p8 = pmov %p1119_p11 }
  0x74   : > { %s240_s7 = scalar_lea.vmem [#allocation8], %s1027_s23 }
  0x75   : > { %782 = vsyncadd (%p1120_p8), [#allocation7], 4294967168 }
  0x76   : > { %784 = dma.done.wait (%p1118_p6), %s225_s8, 16  }
  0x77   : > { %786 = vsyncadd (%p1118_p6), %s225_s8, 4294967280  ;;  %v274_v0 = vld [vmem:[#allocation6] sm:$0xff]  ;;  %v526_v1 = vld [vmem:[%s240_s7] ss:$0 sm:$0xff]  ;;  %vm284_vm0 = vcmask 293888   ;;  %vm329_vm1 = vcmask 1041408  }
  0x78   : > { %v282_v2 = vmul.f32 %v526_v1, %v274_v0  ;;  %v625_v5 = vld [vmem:[%s228_s26 + $0x4] ss:$8 sps:$4 sm:$0xff]   ;;  %v627_v6 = vld [vmem:[%s228_s26] ss:$8 sps:$4 sm:$0xff]   ;;  %v628_v7 = vld [vmem:[%s228_s26 + $0x14] ss:$8 sps:$4 sm:$0xff]  }
  0x79   : > { %336 = vmatprep.subr.bf16.mxu0 %v625_v5  ;;  %v630_v8 = vld [vmem:[%s228_s26 + $0x10] ss:$8 sps:$4 sm:$0xff]   ;;  %v299_v9 = vld [vmem:[%s228_s26 + $0x20] sm:$0x33]  ;;  %v820_v12 = vmov 0   ;;  %vm292_vm2 = vcmask 289792  }
  0x7a   : > { %v283_v3 = vmul.f32 %v282_v2, %v282_v2  ;;  %337 = vmatpush1.bf16.msra.mxu0 %v627_v6  ;;  %v532_v10 = vcombine.high %v299_v9, %v299_v9  ;;  %v531_v11 = vcombine.low %v299_v9, %v299_v9  ;;  %368 = vmatprep.mubr.bf16.mxu0 %v820_v12  ;;  %s525_s27 = sshll.u32 %s1027_s23, 4  ;;  %s540_s25 = sshll.u32 %s805_s15, 8 }
  0x7b   : > { %338 = vmatprep.subr.bf16.mxu0 %v628_v7  ;;  %s266_s6 = scalar_lea.vmem [#allocation9], %s525_s27  ;;  %s1052_s19 = scalar_lea.hbm %s1102_s3, %s540_s25 }
  0x7c   : > { %v285_v4 = vsel %vm284_vm0, %v283_v3, 0.0  ;;  %v331_v13 = vsel %vm329_vm1, %v531_v11, 0  ;;  %s398_s9 = sshll.u32 %s266_s6, 4  ;;  %s380_s22 = scalar_lea.sflag [#allocation5], %s1027_s23  ;;  %s1047_s9 = int_to_ptr.vmem [resolvable:$true] %s398_s9 }
  0x7d   : > { %286 = vadd.xlane.f32.xlu0 %v285_v4  ;;  %s723_s21 = scalar_lea.vmem %s1047_s9, 256  ;;  %p1121_p13 = scmp.ne.s32.totalorder %s1112_s28, 0 }
  0x7e   : > { %339 = vmatpush1.bf16.msra.mxu0 %v630_v8  ;;  %p724_p10 = scmp.ne.s32.totalorder %s1047_s9, %s723_s21  ;;  %s821_s15 = smov [#allocation9]  }
  0x7f   : > { %533 = vmatprep.subr.msk.bf16.mxu0 %vm329_vm1, %v532_v10  ;;  %s727_s29 = sshll.u32 %s821_s15, 4  ;;  %s728_s29 = int_to_ptr.vmem [resolvable:$false] %s727_s29 }
  0x80   : > { %p725_p0 = pnand %p724_p10, %p1121_p13  ;;  %s729_s0 = scalar_lea.vmem %s728_s29, 512 }
  0x81   : > { %p730_p4 = scmp.lt.s32.totalorder %s1047_s9, %s728_s29  ;;  %p731_p1 = scmp.lt.s32.totalorder %s729_s0, %s723_s21 }
  0x82   : > { %341 = vmatpush1.bf16.msra.mxu0 %v331_v13  ;;  %p726_p7 = pneg %p725_p0 }
  0x83   : > { %p732_p3 = por %p731_p1, %p730_p4 }
  0x85   : > { %p733_p2 = pnand %p732_p3, %p726_p7 }
 0x10a   : > { %v287_v14 = vpop.xlane.xlu0 %286 }
 0x10b   : > { %v288_v15 = vadd.f32 1e-08, %v287_v14 }
 0x10d   : > { %633 = vrsqrt.f32 %v288_v15 }
 0x117   : > { %v634_v16 = vpop.eup %633 }
 0x118   : > { %v290_v17 = vmul.f32 %v634_v16, %v282_v2 }
 0x11a   : > { %v291_v18 = vpack.c.bf16 %v290_v17, %v290_v17 }
 0x11c   : > { %293 = vst.msk [vmem:[#allocation2] sm:$0xf] %vm292_vm2, %v291_v18 }
 0x123   : > { %v294_v19 = vld [vmem:[#allocation2] sm:$0xf] }
 0x124   : > { %534 = vmatmul.mubr.msk.bf16.vlgmr.msra.gmra.mrb[0].mxu0 %vm284_vm0, %v294_v19 }
 0x1f7   : > { %v370_v20 = vpop.f32.mrb[0].mxu0 }
 0x1f8   : > { %377 = vst [vmem:[%s266_s6] sm:$0xff] %v370_v20  ;;  %v372_v21 = vpop.f32.mrb[1].mxu0 }
 0x1f9   : > { %378 = vst [vmem:[%s266_s6 + $0x8] sm:$0xff] %v372_v21  ;;  %v374_v22 = vpop.f32.mrb[2].mxu0 }
 0x1fa   : > { %v375_v23 = vpop.f32.mrb[3].mxu0 }
 0x1fb   : > { %736 = shalt.err (!%p733_p2)
}
 0x1fc   : > { %s737_s5 = scalar_lea.hbm %s1052_s19, 256  ;;  %s741_s30 = scalar_lea.hbm %s1102_s3, 512 }
 0x1fd   : > { %p738_p5 = scmp.ne.s32.totalorder %s1052_s19, %s737_s5  ;;  %p742_p6 = scmp.lt.u32.totalorder %s1052_s19, %s1102_s3 }
 0x1fe   : > { %p743_p11 = scmp.lt.u32.totalorder %s741_s30, %s737_s5  ;;  %p745_p10 = scmp.lt.u32.totalorder %s737_s5, %s1052_s19 }
 0x1ff   : > { %p739_p12 = pnand %p738_p5, %p1121_p13 }
 0x200   : > { %p744_p8 = por %p743_p11, %p742_p6 }
 0x201   : > { %p740_p9 = pneg %p739_p12 }
 0x202   : > { %p746_p0 = por %p745_p10, %p744_p8 }
 0x204   : > { %p747_p7 = pnand %p746_p0, %p740_p9 }
 0x206   : > { %750 = shalt.err (!%p747_p7)
}
 0x207   : > { %552 = dma.vmem_to_hbm [thread:$0]  (%p1121_p13), %s1047_s9, 256, %s1052_s19, %s380_s22  }
 0x208 PF: > { %s410_s7 = sand.u32 1, %s793_s12   ;;  %p1122_p4 = scmp.ne.s32.totalorder %s1113_s4, 0 }
 0x209   : > { %p1123_p1 = scmp.ge.s32.totalorder %s813_s17, 2  ;;  %s411_s27 = scalar_lea.sflag [#allocation5], %s410_s7 }
 0x20b   : > { %p566_p3 = pnand %p1123_p1, %p1122_p4 }
 0x20d   : > { %788 = dma.done.wait (!%p566_p3), %s411_s27, 256  }
 0x20e   : > { %790 = vsyncadd (!%p566_p3), %s411_s27, 4294967040  ;;  %s20_s17 = sadd.s32 1, %s813_s17   ;;  %s1124_s12 = smov %s797_s13 }
 0x20f   : > { %p17_p2 = scmp.ge.s32.totalorder %s20_s17, 4   ;;  %s1125_s13 = smov %s801_s14 }
 0x210   : > { %s1126_s14 = smov %s890_s24  ;;  %s1127_s15 = smov %s809_s16 }
 0x211   : > { %s1128_s16 = smov %s1130_s18  ;;  %19 = sbr.rel (!%p17_p2) target bundleno = 9 (0x9), region = 97 }
 0x218   :  { %416 = vsyncpa [#allocation4], 1 }
 0x219   :  { %418 = vsyncpa [#allocation4 + $0x1], 1 }
 0x21a   :  { %419 = vsyncpa [#allocation7], 1 }
 0x21b   :  { %420 = vsyncpa [#allocation5], 1 }
 0x21c   :  { %422 = vsyncpa [#allocation5 + $0x1], 1 }

</bundles_post_ra>
